<compile_context>
chip_gen: v6e
topology: v6e:2x2x1
jax: 0.10.0
libtpu: 0.0.40
codegen_flags: <defaults>
</compile_context>

<pallas_src>
import functools

import jax
import jax.numpy as jnp
from jax.experimental import pallas as pl
from jax.experimental.pallas import tpu as pltpu


def _round_up(x, m):
    return ((x + m - 1) // m) * m


def _largest_dividing_tile(dim_padded, target, unit=128):
    """Largest multiple of `unit` that divides `dim_padded` and is <= target.

    `dim_padded` must itself be a multiple of `unit`, so `unit` is always a
    valid fallback (=> at worst more grid steps, never an extra pad copy).
    """
    n_units = dim_padded // unit
    best = 1
    for d in range(1, n_units + 1):
        if n_units % d == 0 and d * unit <= target:
            best = d
    return best * unit


def _fc_kernel_single_k(x_ref, w_ref, o_ref, *, negative_slope):
    # Full-K tile: one MXU contraction per (row, col) block; activate and
    # store directly — no accumulator scratch, no memset.
    y = jnp.dot(x_ref[...], w_ref[...], preferred_element_type=jnp.float32)
    o_ref[...] = jnp.where(y >= 0, y, negative_slope * y).astype(o_ref.dtype)


def _fc_kernel_multi_k(x_ref, w_ref, o_ref, acc_ref, *, negative_slope):
    # x_ref:   (tm, tk)   input-row tile
    # w_ref:   (tk, tn)   weight tile in (K, N) layout — canonical MXU RHS
    # o_ref:   (tm, tn)   output tile (resident across the k axis)
    # acc_ref: (tm, tn)   f32 accumulator scratch
    k = pl.program_id(2)
    partial = jnp.dot(x_ref[...], w_ref[...], preferred_element_type=jnp.float32)

    @pl.when(k == 0)
    def _():
        acc_ref[...] = partial          # first k-step: plain write (no memset)

    @pl.when(k > 0)
    def _():
        acc_ref[...] += partial

    @pl.when(k == pl.num_programs(2) - 1)
    def _():
        y = acc_ref[...]
        # leaky_relu, negative_slope = 0.01 (PyTorch default for F.leaky_relu)
        o_ref[...] = jnp.where(y >= 0, y, negative_slope * y).astype(o_ref.dtype)


def fc_forward(x, weight, *, negative_slope=0.01,
               tm_target=512, tn_target=512, tk_target=1024,
               weight_buffers=None):
    """Pallas FC forward: leaky_relu(x @ weight.T).

    x:      (batch, input_dim)
    weight: (output_dim, input_dim)   -- nn.Linear layout
    returns (batch, output_dim) in x.dtype (f32 accumulation in-kernel).
    """
    M, K = x.shape
    N, K2 = weight.shape
    assert K2 == K, "weight must be (output_dim, input_dim)"

    itemsize = jnp.dtype(x.dtype).itemsize
    sub = max(8, 32 // itemsize)          # sublane multiple: 8 f32, 16 bf16

    # ---- tile policy: only the cheap 128/sublane alignment pad remains ----
    Kp = _round_up(K, 128)
    tk = _largest_dividing_tile(Kp, tk_target)
    Np = _round_up(N, 128)
    tn = _largest_dividing_tile(Np, tn_target)

    if _round_up(M, sub) <= tm_target:
        tm = _round_up(M, sub)            # small batch: no dead 128-row pad
        Mp = tm
    else:
        tm = tm_target
        Mp = _round_up(M, tm)

    ni, nj, nk = Mp // tm, Np // tn, Kp // tk

    # v7x megacore: expose >= 2 parallel blocks for problems big enough to
    # matter, otherwise one of the two TensorCores idles.
    if ni * nj < 2:
        if Np >= 256:
            tn = _largest_dividing_tile(Np, Np // 2)
            nj = Np // tn
        elif Mp >= 256:
            tm = _round_up((Mp + 1) // 2, sub)
            Mp = _round_up(M, tm)
            ni = Mp // tm

    # ---- pad operands (alignment remainders only; ragged M pads < tm rows) --
    xp = x if (Mp == M and Kp == K) else jnp.pad(x, ((0, Mp - M), (0, Kp - K)))
    # One (K, N) transpose outside the kernel, amortized over every in-kernel
    # re-read; gives the MXU a natural-layout RHS (no per-step transpose).
    w_kn = weight.T
    wp = w_kn if (Kp == K and Np == N) else jnp.pad(
        w_kn, ((0, Kp - K), (0, Np - N)))

    # ---- VMEM budget: double-buffered tiles + accumulator, v7x headroom ----
    x_blk = tm * tk * itemsize
    w_blk = tk * tn * itemsize
    o_blk = tm * tn * itemsize
    acc_blk = tm * tn * 4 if nk > 1 else 0
    need = 2 * (x_blk + w_blk + o_blk) + acc_blk
    vmem_limit = int(min(48 * 1024 * 1024, max(need + (4 << 20), 16 << 20)))

    cost = pl.CostEstimate(
        flops=2 * Mp * Np * Kp,
        transcendentals=0,
        bytes_accessed=(xp.size + wp.size) * itemsize + Mp * Np * itemsize,
    )

    w_spec_kwargs = {}
    if weight_buffers is not None:        # e.g. 3 on v5e if weight DMA exposed
        w_spec_kwargs["pipeline_mode"] = pl.Buffered(weight_buffers)

    if nk == 1:
        # Single-K path: 2-D grid.  The larger operand keys the OUTER grid
        # axis (its block index is constant across the inner loop, so Pallas
        # skips the re-DMA and it is read from HBM exactly once); the smaller
        # operand is re-read n_outer times.
        kernel = functools.partial(_fc_kernel_single_k,
                                   negative_slope=negative_slope)
        if Mp * Kp >= Kp * Np:            # x >= weight: x resident
            grid = (ni, nj)
            x_map = lambda i, j: (i, 0)
            w_map = lambda i, j: (0, j)
            o_map = lambda i, j: (i, j)
        else:                             # weight panel resident
            grid = (nj, ni)
            x_map = lambda j, i: (i, 0)
            w_map = lambda j, i: (0, j)
            o_map = lambda j, i: (i, j)

        out_padded = pl.pallas_call(
            kernel,
            out_shape=jax.ShapeDtypeStruct((Mp, Np), x.dtype),
            grid_spec=pltpu.PrefetchScalarGridSpec(
                num_scalar_prefetch=0,
                grid=grid,
                in_specs=[
                    pl.BlockSpec((tm, Kp), x_map),
                    pl.BlockSpec((Kp, tn), w_map, **w_spec_kwargs),
                ],
                out_specs=pl.BlockSpec((tm, tn), o_map),
            ),
            compiler_params=pltpu.CompilerParams(
                dimension_semantics=("parallel", "parallel"),
                vmem_limit_bytes=vmem_limit,
            ),
            cost_estimate=cost,
        )(xp, wp)
    else:
        # Multi-K path: 3-D grid with f32 accumulator, reduction axis last.
        kernel = functools.partial(_fc_kernel_multi_k,
                                   negative_slope=negative_slope)
        out_padded = pl.pallas_call(
            kernel,
            out_shape=jax.ShapeDtypeStruct((Mp, Np), x.dtype),
            grid_spec=pltpu.PrefetchScalarGridSpec(
                num_scalar_prefetch=0,
                grid=(ni, nj, nk),
                in_specs=[
                    pl.BlockSpec((tm, tk), lambda i, j, k: (i, k)),
                    pl.BlockSpec((tk, tn), lambda i, j, k: (k, j),
                                 **w_spec_kwargs),
                ],
                out_specs=pl.BlockSpec((tm, tn), lambda i, j, k: (i, j)),
                scratch_shapes=[pltpu.VMEM((tm, tn), jnp.float32)],
            ),
            compiler_params=pltpu.CompilerParams(
                dimension_semantics=("parallel", "parallel", "arbitrary"),
                vmem_limit_bytes=vmem_limit,
            ),
            cost_estimate=cost,
        )(xp, wp)

    if Mp == M and Np == N:
        return out_padded
    return out_padded[:M, :N]


def _reference(x, weight, negative_slope=0.01):
    y = x @ weight.T
    return jnp.where(y >= 0, y, negative_slope * y)


if __name__ == "__main__":
    key = jax.random.PRNGKey(0)

    # --- Test 1: module-consistent small shapes (single-K fast path) ---
    batch, input_dim, output_dim = 16, 32, 64
    kx, kw, kx2, kw2 = jax.random.split(key, 4)
    x = jax.random.normal(kx, (batch, input_dim), dtype=jnp.float32)
    bound = 1.0 / (input_dim ** 0.5)
    weight = jax.random.uniform(kw, (output_dim, input_dim),
                                minval=-bound, maxval=bound, dtype=jnp.float32)
    out = jax.block_until_ready(fc_forward(x, weight))
    ref = _reference(x, weight)
    assert out.shape == (batch, output_dim)
    assert jnp.allclose(out, ref, atol=1e-5, rtol=1e-5)

    # --- Test 2: force the multi-K accumulator path (small shapes, tiny tk) --
    K2, N2 = 256, 128
    x2 = jax.random.normal(kx2, (batch, K2), dtype=jnp.float32)
    bound2 = 1.0 / (K2 ** 0.5)
    weight2 = jax.random.uniform(kw2, (N2, K2),
                                 minval=-bound2, maxval=bound2,
                                 dtype=jnp.float32)
    out2 = jax.block_until_ready(fc_forward(x2, weight2, tk_target=128))
    ref2 = _reference(x2, weight2)
    assert out2.shape == (batch, N2)
    assert jnp.allclose(out2, ref2, atol=1e-5, rtol=1e-5)

    print("KERNEL_OK")
</pallas_src>

<mosaic_0001>
module attributes {stable_mosaic.version = 11 : i64} {
  func.func @_fc_kernel_single_k(%arg0: i32, %arg1: i32, %arg2: memref<16x128xf32, #tpu.memory_space<vmem>>, %arg3: memref<128x128xf32, #tpu.memory_space<vmem>>, %arg4: memref<16x128xf32, #tpu.memory_space<vmem>>) attributes {dimension_semantics = [#tpu.dimension_semantics<parallel>, #tpu.dimension_semantics<parallel>], iteration_bounds = array<i64: 1, 1>, scalar_prefetch = 0 : i64, scratch_operands = 0 : i64, tpu.core_type = #tpu.core_type<tc>, window_params = [{transform_indices = @transform_0, window_bounds = array<i64: 16, 128>}, {transform_indices = @transform_1, window_bounds = array<i64: 128, 128>}, {transform_indices = @transform_2, window_bounds = array<i64: 16, 128>}]} {
    %c0 = arith.constant 0 : index
    %c0_0 = arith.constant 0 : index
    %0 = vector.load %arg2[%c0, %c0_0] : memref<16x128xf32, #tpu.memory_space<vmem>>, vector<16x128xf32>
    %c0_1 = arith.constant 0 : index
    %c0_2 = arith.constant 0 : index
    %1 = vector.load %arg3[%c0_1, %c0_2] : memref<128x128xf32, #tpu.memory_space<vmem>>, vector<128x128xf32>
    %cst = arith.constant dense<0.000000e+00> : vector<16x128xf32>
    %2 = tpu.matmul %0, %1, %cst {dimension_numbers = #tpu.dot_dimension_numbers<[1], [0], [0], [1], [0, 0, 1, 1], [], []>} : vector<16x128xf32>, vector<128x128xf32>, vector<16x128xf32> -> vector<16x128xf32>
    %cst_3 = arith.constant 0.000000e+00 : f32
    %3 = vector.broadcast %cst_3 : f32 to vector<16x128xf32>
    %4 = arith.cmpf oge, %2, %3 : vector<16x128xf32>
    %cst_4 = arith.constant 0.00999999977 : f32
    %5 = vector.broadcast %cst_4 : f32 to vector<16x128xf32>
    %6 = arith.mulf %5, %2 : vector<16x128xf32>
    %7 = arith.select %4, %2, %6 : vector<16x128xi1>, vector<16x128xf32>
    %c0_5 = arith.constant 0 : index
    %c0_6 = arith.constant 0 : index
    %8 = vector.load %arg4[%c0_5, %c0_6] : memref<16x128xf32, #tpu.memory_space<vmem>>, vector<16x128xf32>
    tpu.vector_store %arg4[%c0_5, %c0_6], %7 {strides = array<i32>} : memref<16x128xf32, #tpu.memory_space<vmem>>, vector<16x128xf32>,
    return
  }
  func.func @transform_0(%arg0: i32, %arg1: i32) -> (i32, i32) {
    %c0_i32 = arith.constant 0 : i32
    %c0_i32_0 = arith.constant 0 : i32
    return %arg1, %c0_i32 : i32, i32
  }
  func.func @transform_1(%arg0: i32, %arg1: i32) -> (i32, i32) {
    %c0_i32 = arith.constant 0 : i32
    %c0_i32_0 = arith.constant 0 : i32
    return %c0_i32, %arg0 : i32, i32
  }
  func.func @transform_2(%arg0: i32, %arg1: i32) -> (i32, i32) {
    %c0_i32 = arith.constant 0 : i32
    return %arg1, %arg0 : i32, i32
  }
}

</mosaic_0001>

<bundles_post_ra>
// kernel: tpu_custom_call.1
= control target key start
LH: loop header
LB: loop body
LE: loop exit
PB: predicated region body
PF: predicated region fallthrough
CT: control target
= control target key end

     0   :  { %7 = vsyncpa [#allocation3], 0  ;;  %s321_s0 = inlined_call_operand.hbm [shape: f32[16,128], index: 0, kind: input, shape index: {}]   ;;  %s322_s1 = inlined_call_operand.hbm [shape: f32[128,128], index: 1, kind: input, shape index: {}]   ;;  %s323_s2 = inlined_call_operand.hbm [shape: f32[16,128], index: 2, kind: output, shape index: {}]  }
   0x1   :  { %8 = vsyncpa [#allocation6], 0 }
   0x2   :  { %9 = vsyncpa [#allocation4], 0  ;;  %s283_s9 = smov [#allocation2]  }
   0x3   :  { %s15_s10 = sshll.u32 %s283_s9, 4  ;;  %s16_s10 = int_to_ptr.vmem [resolvable:$true] %s15_s10 }
   0x4   :  { %s225_s11 = scalar_lea.vmem %s16_s10, 256  ;;  %p230_p1 = scmp.lt.s32.totalorder %s16_s10, %s16_s10 }
   0x5   :  { %p226_p0 = scmp.ne.s32.totalorder %s16_s10, %s225_s11  ;;  %p231_p2 = scmp.lt.s32.totalorder %s225_s11, %s225_s11 }
   0x7   :  { %p232_p3 = por %p231_p2, %p230_p1 }
   0x9   :  { %p233_p4 = pnand %p232_p3, %p226_p0 }
   0xb   :  { %236 = shalt.err (!%p233_p4)
}
   0xc   :  { %s284_s12 = smov 128   ;;  %s285_s13 = smov 8  }
   0xd   :  { %21 = dma.hbm_to_vmem [thread:$0]  %s321_s0, 256, %s16_s10, [#allocation3], %s284_s12, %s284_s12, %s285_s13  }
   0xe   :  { %s286_s16 = smov [#allocation5]  }
   0xf   :  { %s27_s17 = sshll.u32 %s286_s16, 4  ;;  %s28_s17 = int_to_ptr.vmem [resolvable:$true] %s27_s17 }
  0x10   :  { %s245_s18 = scalar_lea.vmem %s28_s17, 2048  ;;  %p250_p6 = scmp.lt.s32.totalorder %s28_s17, %s28_s17 }
  0x11   :  { %p246_p5 = scmp.ne.s32.totalorder %s28_s17, %s245_s18  ;;  %p251_p7 = scmp.lt.s32.totalorder %s245_s18, %s245_s18 }
  0x13   :  { %p252_p8 = por %p251_p7, %p250_p6 }
  0x15   :  { %p253_p9 = pnand %p252_p8, %p246_p5 }
  0x17   :  { %256 = shalt.err (!%p253_p9)
}
  0x18   :  { %33 = dma.hbm_to_vmem [thread:$0]  %s322_s1, 2048, %s28_s17, [#allocation6], %s284_s12, %s284_s12, %s285_s13  }
  0x19   :  { %277 = dma.done.wait [#allocation3], 256  }
  0x1a   :  { %278 = vsyncadd [#allocation3], 4294967040 }
  0x1b   :  { %279 = dma.done.wait [#allocation6], 2048  }
  0x1c   :  { %280 = vsyncadd [#allocation6], 4294965248  ;;  %v57_v0 = vld [vmem:[#allocation5 + $0x78] sm:$0xff]  ;;  %v56_v1 = vld [vmem:[#allocation5 + $0x70] sm:$0xff]  ;;  %s287_s0 = smov [#allocation7]  }
  0x1d   :  { %177 = vmatprep.subr.mxu0 %v57_v0  ;;  %v55_v2 = vld [vmem:[#allocation5 + $0x68] sm:$0xff]  ;;  %v54_v3 = vld [vmem:[#allocation5 + $0x60] sm:$0xff]  ;;  %v40_v4 = vld [vmem:[#allocation2] sm:$0xff]  ;;  %s146_s1 = sshll.u32 %s287_s0, 4  ;;  %s147_s1 = int_to_ptr.vmem [resolvable:$true] %s146_s1 }
  0x1e   :  { %178 = vmatpush3.msra.mxu0 %v57_v0  ;;  %v53_v5 = vld [vmem:[#allocation5 + $0x58] sm:$0xff]  ;;  %209 = vmatprep.mubr.f32.mxu0 %v40_v4  ;;  %v52_v6 = vld [vmem:[#allocation5 + $0x50] sm:$0xff]  ;;  %v51_v7 = vld [vmem:[#allocation5 + $0x48] sm:$0xff]  ;;  %s257_s21 = scalar_lea.vmem %s147_s1, 256  ;;  %p262_p11 = scmp.lt.s32.totalorder %s147_s1, %s147_s1 }
  0x1f   :  { %179 = vmatprep.subr.mxu0 %v56_v1  ;;  %v50_v8 = vld [vmem:[#allocation5 + $0x40] sm:$0xff]  ;;  %v49_v9 = vld [vmem:[#allocation5 + $0x38] sm:$0xff]  ;;  %v48_v10 = vld [vmem:[#allocation5 + $0x30] sm:$0xff]  ;;  %p258_p10 = scmp.ne.s32.totalorder %s147_s1, %s257_s21  ;;  %p263_p12 = scmp.lt.s32.totalorder %s257_s21, %s257_s21 }
  0x20   :  { %180 = vmatpush3.msra.mxu0 %v56_v1  ;;  %v47_v11 = vld [vmem:[#allocation5 + $0x28] sm:$0xff]  ;;  %v46_v12 = vld [vmem:[#allocation5 + $0x20] sm:$0xff]  ;;  %v45_v13 = vld [vmem:[#allocation5 + $0x18] sm:$0xff] }
  0x21   :  { %181 = vmatprep.subr.mxu0 %v55_v2  ;;  %v44_v14 = vld [vmem:[#allocation5 + $0x10] sm:$0xff]  ;;  %v43_v15 = vld [vmem:[#allocation5 + $0x8] sm:$0xff]  ;;  %v42_v16 = vld [vmem:[#allocation5] sm:$0xff]  ;;  %p264_p13 = por %p263_p12, %p262_p11 }
  0x22   :  { %182 = vmatpush3.msra.mxu0 %v55_v2  ;;  %v41_v17 = vld [vmem:[#allocation2 + $0x8] sm:$0xff] }
  0x23   :  { %183 = vmatprep.subr.mxu0 %v54_v3  ;;  %p265_p0 = pnand %p264_p13, %p258_p10 }
  0x24   :  { %184 = vmatpush3.msra.mxu0 %v54_v3 }
  0x25   :  { %185 = vmatprep.subr.mxu0 %v53_v5 }
  0x26   :  { %186 = vmatpush3.msra.mxu0 %v53_v5 }
  0x27   :  { %187 = vmatprep.subr.mxu0 %v52_v6 }
  0x28   :  { %188 = vmatpush3.msra.mxu0 %v52_v6 }
  0x29   :  { %189 = vmatprep.subr.mxu0 %v51_v7 }
  0x2a   :  { %190 = vmatpush3.msra.mxu0 %v51_v7 }
  0x2b   :  { %191 = vmatprep.subr.mxu0 %v50_v8 }
  0x2c   :  { %192 = vmatpush3.msra.mxu0 %v50_v8 }
  0x2d   :  { %193 = vmatprep.subr.mxu0 %v49_v9 }
  0x2e   :  { %194 = vmatpush3.msra.mxu0 %v49_v9 }
  0x2f   :  { %195 = vmatprep.subr.mxu0 %v48_v10 }
  0x30   :  { %196 = vmatpush3.msra.mxu0 %v48_v10 }
  0x31   :  { %197 = vmatprep.subr.mxu0 %v47_v11 }
  0x32   :  { %198 = vmatpush3.msra.mxu0 %v47_v11 }
  0x33   :  { %199 = vmatprep.subr.mxu0 %v46_v12 }
  0x34   :  { %200 = vmatpush3.msra.mxu0 %v46_v12 }
  0x35   :  { %201 = vmatprep.subr.mxu0 %v45_v13 }
  0x36   :  { %202 = vmatpush3.msra.mxu0 %v45_v13 }
  0x37   :  { %203 = vmatprep.subr.mxu0 %v44_v14 }
  0x38   :  { %204 = vmatpush3.msra.mxu0 %v44_v14 }
  0x39   :  { %205 = vmatprep.subr.mxu0 %v43_v15 }
  0x3a   :  { %206 = vmatpush3.msra.mxu0 %v43_v15 }
  0x3b   :  { %207 = vmatprep.subr.mxu0 %v42_v16 }
  0x3c   :  { %208 = vmatpush3.msra.mxu0 %v42_v16 }
  0x3d   :  { %210 = vmatmul.mubr.f32.vlgmr.msra.gmra.mxu0 %v41_v17 }
  0xfd   :  { %v211_v18 = vpop.f32.mrf.mxu0 }
  0xfe   :  { %vm134_vm0 = vcmp.ge.f32.partialorder %v211_v18, 0.0  ;;  %v136_v19 = vmul.f32 0.01, %v211_v18 }
  0xff   :  { %v124_v20 = vpop.f32.mrf.mxu0 }
 0x100   :  { %v138_v21 = vsel %vm134_vm0, %v211_v18, %v136_v19  ;;  %vm133_vm1 = vcmp.ge.f32.partialorder %v124_v20, 0.0  ;;  %v135_v22 = vmul.f32 0.01, %v124_v20 }
 0x101   :  { %140 = vst [vmem:[#allocation7 + $0x8] sm:$0xff] %v138_v21 }
 0x102   :  { %v137_v23 = vsel %vm133_vm1, %v124_v20, %v135_v22 }
 0x103   :  { %139 = vst [vmem:[#allocation7] sm:$0xff] %v137_v23 }
 0x104   :  { %268 = shalt.err (!%p265_p0)
}
 0x105   :  { %152 = dma.vmem_to_hbm [thread:$0]  %s147_s1, 256, %s323_s2, [#allocation4], %s284_s12, %s284_s12, %s285_s13  }
 0x106   :  { %281 = dma.done.wait [#allocation4], 256  }
 0x107   :  { %282 = vsyncadd [#allocation4], 4294967040 }
 0x108   :  { %156 = vsyncpa [#allocation3], 1 }
 0x109   :  { %157 = vsyncpa [#allocation6], 1 }
 0x10a   :  { %158 = vsyncpa [#allocation4], 1 }

</bundles_post_ra>
